<compile_context>
chip_gen: v7x
topology: tpu7x:2x2x1
jax: 0.10.0
libtpu: 0.0.40
codegen_flags: <defaults>
</compile_context>

<pallas_src>
from functools import partial

import numpy as np

import jax
import jax.numpy as jnp
from jax.experimental import pallas as pl
from jax.experimental.pallas import tpu as pltpu


def _attention_kernel(x_ref, xq_ref, wq_ref, wkv_ref, wo_ref, bias_ref,
                      o_ref, q_scr, kv_scr, out_scr, *,
                      heads, dim_head, matmul_dtype, exact):
    """One grid step == (batch element b, query tile qt); heads looped inside.

    x_ref   : (1, C, N)   full channels-first input (grid-invariant in qt)
    xq_ref  : (1, C, TQ)  query-tile slice of the same input
    wq_ref  : (HD, C)     Q projection rows (q scale pre-folded), MXU dtype
    wkv_ref : (2*HD, C)   fused K/V projection rows, MXU dtype
    wo_ref  : (C, HD)     output projection, MXU dtype
    bias_ref: (C, 1)      output projection bias, f32
    o_ref   : (1, C, TQ)  output tile (lane-dense on the sequence axis)
    q_scr   : (HD, TQ)    VMEM scratch, MXU dtype
    kv_scr  : (2*HD, N)   VMEM scratch, MXU dtype
    out_scr : (HD, TQ)    VMEM scratch, MXU dtype
    """
    H, Dh = heads, dim_head
    HD = H * Dh
    N = x_ref.shape[2]

    def mm(a, b, contract):
        # MXU matmul with f32 accumulation.
        return jax.lax.dot_general(a, b, (contract, ((), ())),
                                   preferred_element_type=jnp.float32)

    # ---- fused 1x1-conv projections --------------------------------------
    # K/V over the full sequence (recomputed per query tile: MXU has slack,
    # and this keeps the query-tile grid axis embarrassingly parallel).
    kv = mm(wkv_ref[...], x_ref[0].astype(matmul_dtype), ((1,), (0,)))    # (2*HD, N)
    kv_scr[...] = kv.astype(kv_scr.dtype)
    # Q for this query tile only (scale already folded into the weight rows).
    q_all = mm(wq_ref[...], xq_ref[0].astype(matmul_dtype), ((1,), (0,)))  # (HD, TQ)
    q_scr[...] = q_all.astype(q_scr.dtype)

    # Ones row for MXU row-sums of the probability matrix; result comes out in
    # the (1, TQ) lane layout needed to rescale the head output.  Hoisted out
    # of the head loop (broadcasts are not CSE'd).
    ones_row = jnp.ones((1, N), matmul_dtype)

    # ---- per-head attention (fori_loop bounds each head's live range) -----
    def head_body(h, carry):
        off_k = pl.multiple_of(h * Dh, Dh)
        off_v = pl.multiple_of(HD + h * Dh, Dh)
        q = q_scr[pl.ds(off_k, Dh), :]        # (Dh, TQ)
        k = kv_scr[pl.ds(off_k, Dh), :]       # (Dh, N)
        v = kv_scr[pl.ds(off_v, Dh), :]       # (Dh, N)

        # sim[i, j] = sum_d q[d, i] * k[d, j] -> (TQ, N); every query row is
        # complete, so the shifted softmax below is exact.
        sim = mm(q, k, ((0,), (0,)))
        sim = sim - jnp.max(sim, axis=-1, keepdims=True)
        p = jnp.exp(sim.astype(matmul_dtype))                # (TQ, N) MXU dtype
        l = mm(ones_row, p, ((1,), (1,)))                    # (1, TQ) row sums, f32
        inv_l = pl.reciprocal(l, approx=not exact)

        # Unnormalized PV product, normalized AFTER the matmul:
        #   out_h[d, i] = (sum_j v[d, j] * p[i, j]) / l[i]
        out_h = mm(v, p, ((1,), (1,)))                        # (Dh, TQ) f32
        out_scr[pl.ds(off_k, Dh), :] = (out_h * inv_l).astype(out_scr.dtype)
        return carry

    jax.lax.fori_loop(0, H, head_body, 0)

    # ---- output projection (1x1 conv) + bias, one lane-dense store --------
    y = mm(wo_ref[...], out_scr[...], ((1,), (0,)))           # (C, TQ)
    o_ref[0] = (y + bias_ref[...]).astype(o_ref.dtype)


def _vmem_cap_bytes():
    """Usable scoped-VMEM cap for this chip (leave headroom for the compiler)."""
    try:
        return int(pltpu.get_tpu_info().vmem_capacity_bytes) * 7 // 8
    except Exception:
        return 56 << 20   # conservative default: v7x has 64 MiB per TensorCore


def _vmem_estimate_bytes(C, N, TQ, HD, matmul_dtype):
    """Rough per-grid-step VMEM footprint for the kernel above."""
    f32 = 4
    pb = int(np.dtype(matmul_dtype).itemsize)
    est = 0
    est += 2 * C * N * f32                                 # x full block (x2 buffers)
    est += 2 * C * TQ * f32                                # x query-tile block
    est += 2 * C * TQ * f32                                # output block
    est += 2 * ((3 * HD * C + C * HD) * pb + C * f32)      # weights + bias
    est += (2 * HD * N + 2 * HD * TQ) * pb                 # kv / q / out scratch slabs
    est += TQ * N * (f32 + pb)                             # sim (f32) + p (MXU dtype)
    est += 2 * HD * N * f32                                # kv projection before cast
    est += (HD * TQ + C * TQ) * f32                        # head output / final proj
    return int(est * 1.4) + (2 << 20)                      # pipelining / layout margin


def _pick_q_tile(C, N, HD, matmul_dtype, target=512):
    """Largest query tile that (a) is a multiple-of-128 divisor of N (exact
    tiling, lane-dense output blocks, no ragged tile) and (b) fits the chip's
    VMEM budget.  Falls back to a single full-width tile."""
    if N <= target:
        return N
    cands = [t for t in range(128, target + 1, 128) if N % t == 0]
    if not cands:
        return N
    cap = _vmem_cap_bytes()
    for t in sorted(cands, reverse=True):
        if _vmem_estimate_bytes(C, N, t, HD, matmul_dtype) <= cap:
            return t
    return cands[0]


def attention_forward(x, w_qkv, w_out, b_out, *, heads, dim_head,
                      matmul_dtype=jnp.bfloat16, q_tile=512):
    """x: [B, dim, N] float32.  Returns [B, dim, N] float32 (PyTorch layout).

    matmul_dtype: dtype of MXU operands / softmax probabilities (accumulation
      is always f32).  jnp.bfloat16 -> full MXU + bf16-EUP rate on v6e/v7x;
      jnp.float32 -> exact path (exact reciprocal, f32 exp).
    """
    B, C, N = x.shape
    H, Dh = heads, dim_head
    HD = H * Dh
    scale = float(Dh) ** -0.5
    exact = np.dtype(matmul_dtype) == np.dtype(jnp.float32)

    TQ = _pick_q_tile(C, N, HD, matmul_dtype, target=q_tile)
    n_q_tiles = N // TQ
    vmem_limit = int(min(max(_vmem_estimate_bytes(C, N, TQ, HD, matmul_dtype),
                             32 << 20),
                         _vmem_cap_bytes()))

    # Fold the q scale into the Wq rows and pre-cast weights to the MXU dtype
    # (one-time tiny casts outside the kernel; halves in-VMEM weight bytes and
    # removes per-step VPU casts of the weight blocks).
    w_q = (w_qkv[:HD] * scale).astype(matmul_dtype)       # (HD, C)
    w_kv = w_qkv[HD:].astype(matmul_dtype)                # (2*HD, C) = [Wk; Wv]
    w_o = w_out.astype(matmul_dtype)                      # (C, HD)
    bias2d = b_out.reshape(C, 1).astype(jnp.float32)

    kernel = partial(_attention_kernel, heads=H, dim_head=Dh,
                     matmul_dtype=matmul_dtype, exact=exact)

    return pl.pallas_call(
        kernel,
        out_shape=jax.ShapeDtypeStruct((B, C, N), x.dtype),
        grid_spec=pltpu.PrefetchScalarGridSpec(
            num_scalar_prefetch=0,
            grid=(B, n_q_tiles),
            in_specs=[
                pl.BlockSpec((1, C, N), lambda b, qt: (b, 0, 0)),    # x (full, K/V)
                pl.BlockSpec((1, C, TQ), lambda b, qt: (b, 0, qt)),  # x (query tile)
                pl.BlockSpec((HD, C), lambda b, qt: (0, 0)),         # W_q (scaled)
                pl.BlockSpec((2 * HD, C), lambda b, qt: (0, 0)),     # W_kv
                pl.BlockSpec((C, HD), lambda b, qt: (0, 0)),         # W_out
                pl.BlockSpec((C, 1), lambda b, qt: (0, 0)),          # bias
            ],
            out_specs=pl.BlockSpec((1, C, TQ), lambda b, qt: (b, 0, qt)),
            scratch_shapes=[
                pltpu.VMEM((HD, TQ), matmul_dtype),        # q_scr
                pltpu.VMEM((2 * HD, N), matmul_dtype),     # kv_scr
                pltpu.VMEM((HD, TQ), matmul_dtype),        # out_scr
            ],
        ),
        compiler_params=pltpu.CompilerParams(
            dimension_semantics=("parallel", "parallel"),
            vmem_limit_bytes=vmem_limit),
    )(x, x, w_q, w_kv, w_o, bias2d)


def attention_reference(x, w_qkv, w_out, b_out, *, heads, dim_head):
    """Pure-JAX reference mirroring the PyTorch forward exactly."""
    B, C, N = x.shape
    H, Dh = heads, dim_head
    scale = float(Dh) ** -0.5
    hp = jax.lax.Precision.HIGHEST
    qkv = jnp.einsum('oc,bcn->bon', w_qkv, x, precision=hp)   # [B, 3*H*Dh, N]
    q, k, v = jnp.split(qkv, 3, axis=1)
    q = q.reshape(B, H, Dh, N) * scale
    k = k.reshape(B, H, Dh, N)
    v = v.reshape(B, H, Dh, N)
    sim = jnp.einsum('bhdi,bhdj->bhij', q, k, precision=hp)
    attn = jax.nn.softmax(sim, axis=-1)
    out = jnp.einsum('bhij,bhdj->bhid', attn, v, precision=hp)  # [B, H, N, Dh]
    out = jnp.transpose(out, (0, 1, 3, 2)).reshape(B, H * Dh, N)
    return jnp.einsum('oc,bcn->bon', w_out, out, precision=hp) + b_out[None, :, None]


if __name__ == "__main__":
    def run_case(B, dim, N, heads, dim_head, key, tol_f32, tol_bf16):
        hidden = heads * dim_head
        kx, kqkv, kwo, kbo = jax.random.split(key, 4)
        x = jax.random.normal(kx, (B, dim, N), dtype=jnp.float32)
        # Deterministic parameter init (Conv1d kernel_size=1 weights, squeezed).
        w_qkv = jax.random.normal(kqkv, (hidden * 3, dim), dtype=jnp.float32) * (dim ** -0.5)
        w_out = jax.random.normal(kwo, (dim, hidden), dtype=jnp.float32) * (hidden ** -0.5)
        b_out = jax.random.normal(kbo, (dim,), dtype=jnp.float32) * 0.1

        y_ref = attention_reference(x, w_qkv, w_out, b_out,
                                    heads=heads, dim_head=dim_head)

        # Exact path: f32 MXU operands + exact reciprocal.
        y_f32 = jax.block_until_ready(attention_forward(
            x, w_qkv, w_out, b_out, heads=heads, dim_head=dim_head,
            matmul_dtype=jnp.float32))
        assert y_f32.shape == (B, dim, N)
        err = float(jnp.max(jnp.abs(y_f32 - y_ref)))
        assert err < tol_f32, f"f32 path mismatch at ({B},{dim},{N}): {err}"

        # Throughput path: bf16 MXU operands / bf16 exp, f32 accumulation.
        y_bf16 = jax.block_until_ready(attention_forward(
            x, w_qkv, w_out, b_out, heads=heads, dim_head=dim_head,
            matmul_dtype=jnp.bfloat16))
        assert y_bf16.shape == (B, dim, N)
        err = float(jnp.max(jnp.abs(y_bf16 - y_ref)))
        assert err < tol_bf16, f"bf16 path mismatch at ({B},{dim},{N}): {err}"

    root = jax.random.PRNGKey(0)
    # Small shapes consistent with the module defaults (single query tile).
    run_case(B=2, dim=4, N=16, heads=4, dim_head=32,
             key=root, tol_f32=1e-3, tol_bf16=1e-1)
    # Moderate realistic shape exercising multi-tile query tiling (N/TQ = 2),
    # the fori_loop head path and the (batch, query-tile) parallel grid.
    run_case(B=2, dim=32, N=1024, heads=4, dim_head=32,
             key=jax.random.fold_in(root, 1), tol_f32=1e-2, tol_bf16=2e-1)

    print("KERNEL_OK")
</pallas_src>

<mosaic_0001>
module attributes {stable_mosaic.version = 11 : i64} {
  func.func @_attention_kernel(%arg0: i32, %arg1: i32, %arg2: memref<1x4x16xf32, #tpu.memory_space<vmem>>, %arg3: memref<1x4x16xf32, #tpu.memory_space<vmem>>, %arg4: memref<128x4xf32, #tpu.memory_space<vmem>>, %arg5: memref<256x4xf32, #tpu.memory_space<vmem>>, %arg6: memref<4x128xf32, #tpu.memory_space<vmem>>, %arg7: memref<4x1xf32, #tpu.memory_space<vmem>>, %arg8: memref<1x4x16xf32, #tpu.memory_space<vmem>>, %arg9: memref<128x16xf32, #tpu.memory_space<vmem>>, %arg10: memref<256x16xf32, #tpu.memory_space<vmem>>, %arg11: memref<128x16xf32, #tpu.memory_space<vmem>>) attributes {dimension_semantics = [#tpu.dimension_semantics<parallel>, #tpu.dimension_semantics<parallel>], iteration_bounds = array<i64: 2, 1>, scalar_prefetch = 0 : i64, scratch_operands = 3 : i64, tpu.core_type = #tpu.core_type<tc>, window_params = [{transform_indices = @transform_0, window_bounds = array<i64: 1, 4, 16>}, {transform_indices = @transform_1, window_bounds = array<i64: 1, 4, 16>}, {pipeline_mode = #tpu.pipeline_mode<synchronous>, transform_indices = @transform_2, window_bounds = array<i64: 128, 4>}, {pipeline_mode = #tpu.pipeline_mode<synchronous>, transform_indices = @transform_3, window_bounds = array<i64: 256, 4>}, {pipeline_mode = #tpu.pipeline_mode<synchronous>, transform_indices = @transform_4, window_bounds = array<i64: 4, 128>}, {pipeline_mode = #tpu.pipeline_mode<synchronous>, transform_indices = @transform_5, window_bounds = array<i64: 4, 1>}, {transform_indices = @transform_6, window_bounds = array<i64: 1, 4, 16>}]} {
    %c0 = arith.constant 0 : index
    %c0_0 = arith.constant 0 : index
    %0 = vector.load %arg5[%c0, %c0_0] : memref<256x4xf32, #tpu.memory_space<vmem>>, vector<256x4xf32>
    %c0_1 = arith.constant 0 : index
    %c0_2 = arith.constant 0 : index
    %c0_3 = arith.constant 0 : index
    %1 = vector.load %arg2[%c0_1, %c0_2, %c0_3] : memref<1x4x16xf32, #tpu.memory_space<vmem>>, vector<1x4x16xf32>
    %2 = vector.shape_cast %1 : vector<1x4x16xf32> to vector<4x16xf32>
    %cst = arith.constant dense<0.000000e+00> : vector<256x16xf32>
    %3 = tpu.matmul %0, %2, %cst {dimension_numbers = #tpu.dot_dimension_numbers<[1], [0], [0], [1], [0, 0, 1, 1], [], []>} : vector<256x4xf32>, vector<4x16xf32>, vector<256x16xf32> -> vector<256x16xf32>
    %c0_4 = arith.constant 0 : index
    %c0_5 = arith.constant 0 : index
    %4 = vector.load %arg10[%c0_4, %c0_5] : memref<256x16xf32, #tpu.memory_space<vmem>>, vector<256x16xf32>
    tpu.vector_store %arg10[%c0_4, %c0_5], %3 {strides = array<i32>} : memref<256x16xf32, #tpu.memory_space<vmem>>, vector<256x16xf32>,
    %c0_6 = arith.constant 0 : index
    %c0_7 = arith.constant 0 : index
    %5 = vector.load %arg4[%c0_6, %c0_7] : memref<128x4xf32, #tpu.memory_space<vmem>>, vector<128x4xf32>
    %c0_8 = arith.constant 0 : index
    %c0_9 = arith.constant 0 : index
    %c0_10 = arith.constant 0 : index
    %6 = vector.load %arg3[%c0_8, %c0_9, %c0_10] : memref<1x4x16xf32, #tpu.memory_space<vmem>>, vector<1x4x16xf32>
    %7 = vector.shape_cast %6 : vector<1x4x16xf32> to vector<4x16xf32>
    %cst_11 = arith.constant dense<0.000000e+00> : vector<128x16xf32>
    %8 = tpu.matmul %5, %7, %cst_11 {dimension_numbers = #tpu.dot_dimension_numbers<[1], [0], [0], [1], [0, 0, 1, 1], [], []>} : vector<128x4xf32>, vector<4x16xf32>, vector<128x16xf32> -> vector<128x16xf32>
    %c0_12 = arith.constant 0 : index
    %c0_13 = arith.constant 0 : index
    %9 = vector.load %arg9[%c0_12, %c0_13] : memref<128x16xf32, #tpu.memory_space<vmem>>, vector<128x16xf32>
    tpu.vector_store %arg9[%c0_12, %c0_13], %8 {strides = array<i32>} : memref<128x16xf32, #tpu.memory_space<vmem>>, vector<128x16xf32>,
    %cst_14 = arith.constant 1.000000e+00 : f32
    %10 = vector.broadcast %cst_14 : f32 to vector<1x16xf32>
    %c0_i32 = arith.constant 0 : i32
    %c4_i32 = arith.constant 4 : i32
    %11 = arith.addi %c0_i32, %c4_i32 : i32
    %c1_i32 = arith.constant 1 : i32
    scf.for %arg12 = %c0_i32 to %11 step %c1_i32  : i32 {
      %c32_i32 = arith.constant 32 : i32
      %21 = arith.muli %arg12, %c32_i32 : i32
      %22 = tpu.assume_multiple %21, 32 : i32
      %c32_i32_26 = arith.constant 32 : i32
      %23 = arith.muli %arg12, %c32_i32_26 : i32
      %c128_i32 = arith.constant 128 : i32
      %24 = arith.addi %c128_i32, %23 : i32
      %25 = tpu.assume_multiple %24, 32 : i32
      %26 = arith.index_cast %22 : i32 to index
      %c0_27 = arith.constant 0 : index
      %27 = vector.load %arg9[%26, %c0_27] : memref<128x16xf32, #tpu.memory_space<vmem>>, vector<32x16xf32>
      %28 = arith.index_cast %22 : i32 to index
      %c0_28 = arith.constant 0 : index
      %29 = vector.load %arg10[%28, %c0_28] : memref<256x16xf32, #tpu.memory_space<vmem>>, vector<32x16xf32>
      %30 = arith.index_cast %25 : i32 to index
      %c0_29 = arith.constant 0 : index
      %31 = vector.load %arg10[%30, %c0_29] : memref<256x16xf32, #tpu.memory_space<vmem>>, vector<32x16xf32>
      %cst_30 = arith.constant dense<0.000000e+00> : vector<16x16xf32>
      %32 = tpu.matmul %27, %29, %cst_30 {dimension_numbers = #tpu.dot_dimension_numbers<[0], [0], [1], [1], [0, 1, 1, 1], [], []>} : vector<32x16xf32>, vector<32x16xf32>, vector<16x16xf32> -> vector<16x16xf32>
      %cst_31 = arith.constant dense<0xFF800000> : vector<16xf32>
      %33 = vector.multi_reduction <maximumf>, %32, %cst_31 [1] : vector<16x16xf32> to vector<16xf32>
      %34 = vector.shape_cast %33 : vector<16xf32> to vector<16x1xf32>
      %35 = vector.broadcast %34 : vector<16x1xf32> to vector<16x16xf32>
      %36 = arith.subf %32, %35 : vector<16x16xf32>
      %37 = math.exp %36 : vector<16x16xf32>
      %cst_32 = arith.constant dense<0.000000e+00> : vector<1x16xf32>
      %38 = tpu.matmul %10, %37, %cst_32 {dimension_numbers = #tpu.dot_dimension_numbers<[1], [1], [0], [0], [0, 0, 1, 0], [], []>} : vector<1x16xf32>, vector<16x16xf32>, vector<1x16xf32> -> vector<1x16xf32>
      %39 = tpu.reciprocal %38 : vector<1x16xf32> -> vector<1x16xf32>
      %cst_33 = arith.constant dense<0.000000e+00> : vector<32x16xf32>
      %40 = tpu.matmul %31, %37, %cst_33 {dimension_numbers = #tpu.dot_dimension_numbers<[1], [1], [0], [0], [0, 0, 1, 0], [], []>} : vector<32x16xf32>, vector<16x16xf32>, vector<32x16xf32> -> vector<32x16xf32>
      %41 = vector.broadcast %39 : vector<1x16xf32> to vector<32x16xf32>
      %42 = arith.mulf %40, %41 : vector<32x16xf32>
      %43 = arith.index_cast %22 : i32 to index
      %c0_34 = arith.constant 0 : index
      %44 = vector.load %arg11[%43, %c0_34] : memref<128x16xf32, #tpu.memory_space<vmem>>, vector<32x16xf32>
      tpu.vector_store %arg11[%43, %c0_34], %42 {strides = array<i32>} : memref<128x16xf32, #tpu.memory_space<vmem>>, vector<32x16xf32>,
    }
    %c4_i32_15 = arith.constant 4 : i32
    %c0_16 = arith.constant 0 : index
    %c0_17 = arith.constant 0 : index
    %12 = vector.load %arg6[%c0_16, %c0_17] : memref<4x128xf32, #tpu.memory_space<vmem>>, vector<4x128xf32>
    %c0_18 = arith.constant 0 : index
    %c0_19 = arith.constant 0 : index
    %13 = vector.load %arg11[%c0_18, %c0_19] : memref<128x16xf32, #tpu.memory_space<vmem>>, vector<128x16xf32>
    %cst_20 = arith.constant dense<0.000000e+00> : vector<4x16xf32>
    %14 = tpu.matmul %12, %13, %cst_20 {dimension_numbers = #tpu.dot_dimension_numbers<[1], [0], [0], [1], [0, 0, 1, 1], [], []>} : vector<4x128xf32>, vector<128x16xf32>, vector<4x16xf32> -> vector<4x16xf32>
    %c0_21 = arith.constant 0 : index
    %c0_22 = arith.constant 0 : index
    %15 = vector.load %arg7[%c0_21, %c0_22] : memref<4x1xf32, #tpu.memory_space<vmem>>, vector<4x1xf32>
    %16 = vector.broadcast %15 : vector<4x1xf32> to vector<4x16xf32>
    %17 = arith.addf %14, %16 : vector<4x16xf32>
    %c0_23 = arith.constant 0 : index
    %c0_24 = arith.constant 0 : index
    %c0_25 = arith.constant 0 : index
    %18 = vector.load %arg8[%c0_23, %c0_24, %c0_25] : memref<1x4x16xf32, #tpu.memory_space<vmem>>, vector<1x4x16xf32>
    %19 = vector.shape_cast %18 : vector<1x4x16xf32> to vector<4x16xf32>
    %20 = vector.shape_cast %17 : vector<4x16xf32> to vector<1x4x16xf32>
    tpu.vector_store %arg8[%c0_23, %c0_24, %c0_25], %20 {strides = array<i32>} : memref<1x4x16xf32, #tpu.memory_space<vmem>>, vector<1x4x16xf32>,
    return
  }
  func.func @transform_0(%arg0: i32, %arg1: i32) -> (i32, i32, i32) {
    %c0_i32 = arith.constant 0 : i32
    %c0_i32_0 = arith.constant 0 : i32
    %c0_i32_1 = arith.constant 0 : i32
    return %arg0, %c0_i32, %c0_i32_0 : i32, i32, i32
  }
  func.func @transform_1(%arg0: i32, %arg1: i32) -> (i32, i32, i32) {
    %c0_i32 = arith.constant 0 : i32
    %c0_i32_0 = arith.constant 0 : i32
    return %arg0, %c0_i32, %arg1 : i32, i32, i32
  }
  func.func @transform_2(%arg0: i32, %arg1: i32) -> (i32, i32) {
    %c0_i32 = arith.constant 0 : i32
    %c0_i32_0 = arith.constant 0 : i32
    %c0_i32_1 = arith.constant 0 : i32
    return %c0_i32, %c0_i32_0 : i32, i32
  }
  func.func @transform_3(%arg0: i32, %arg1: i32) -> (i32, i32) {
    %c0_i32 = arith.constant 0 : i32
    %c0_i32_0 = arith.constant 0 : i32
    %c0_i32_1 = arith.constant 0 : i32
    return %c0_i32, %c0_i32_0 : i32, i32
  }
  func.func @transform_4(%arg0: i32, %arg1: i32) -> (i32, i32) {
    %c0_i32 = arith.constant 0 : i32
    %c0_i32_0 = arith.constant 0 : i32
    %c0_i32_1 = arith.constant 0 : i32
    return %c0_i32, %c0_i32_0 : i32, i32
  }
  func.func @transform_5(%arg0: i32, %arg1: i32) -> (i32, i32) {
    %c0_i32 = arith.constant 0 : i32
    %c0_i32_0 = arith.constant 0 : i32
    %c0_i32_1 = arith.constant 0 : i32
    return %c0_i32, %c0_i32_0 : i32, i32
  }
  func.func @transform_6(%arg0: i32, %arg1: i32) -> (i32, i32, i32) {
    %c0_i32 = arith.constant 0 : i32
    %c0_i32_0 = arith.constant 0 : i32
    return %arg0, %c0_i32, %arg1 : i32, i32, i32
  }
}

</mosaic_0001>

<bundles_post_ra>
// kernel: tpu_custom_call.1
= control target key start
LH: loop header
LB: loop body
LE: loop exit
PB: predicated region body
PF: predicated region fallthrough
CT: control target
= control target key end

     0   :  { %11 = vsyncpa [#allocation6], 0  ;;  %s2425_s0 = inlined_call_operand.vmem [shape: f32[2,4,16], index: 0, kind: input, shape index: {}]   ;;  %s2426_s1 = inlined_call_operand.vmem [shape: f32[2,4,16], index: 1, kind: input, shape index: {}]   ;;  %s2427_s2 = inlined_call_operand.vmem [shape: f32[128,4], index: 2, kind: input, shape index: {}]   ;;  %s2428_s3 = inlined_call_operand.vmem [shape: f32[256,4], index: 3, kind: input, shape index: {}]   ;;  %s2429_s4 = inlined_call_operand.vmem [shape: f32[4,128], index: 4, kind: input, shape index: {}]   ;;  %s2430_s5 = inlined_call_operand.vmem [shape: f32[4,1], index: 5, kind: input, shape index: {}]   ;;  %s2431_s6 = inlined_call_operand.hbm [shape: f32[2,4,16], index: 6, kind: output, shape index: {}]  }
   0x1   :  { %13 = vsyncpa [#allocation6 + $0x1], 0  ;;  %s2010_s21 = smov 0   ;;  %s2012_s22 = smov 0  }
   0x2   :  { %s2014_s23 = smov 0   ;;  %s2016_s24 = smov 0  }
   0x3   :  { %s2018_s25 = smov 0   ;;  %s2020_s26 = smov 0  }
   0x4 LB: > { %s1456_s27 = sadd.s32 4294967295, %s1960_s26   ;;  %s1457_s28 = sadd.s32 4294967294, %s1960_s26   ;;  %s1960_s26 = sphi %s2020_s26, %s19_s26   ;;  %s1956_s25 = sphi %s2018_s25, %s2438_s25   ;;  %s1952_s24 = sphi %s2016_s24, %s2437_s24   ;;  %s1948_s23 = sphi %s2014_s23, %s2436_s23   ;;  %s1944_s22 = sphi %s2012_s22, %s2435_s22   ;;  %s1940_s21 = sphi %s2010_s21, %s2434_s21  }
   0x5   : > { %s31_s29 = sadd.s32 1, %s1956_s25  ;;  %s178_s30 = sadd.s32 1, %s1948_s23 }
   0x6   : > { %p33_p0 = scmp.ge.s32.totalorder %s31_s29, 2  ;;  %p188_p1 = scmp.ne.s32.totalorder %s1948_s23, %s1944_s22 }
   0x7   : > { %p189_p2 = scmp.eq.s32.totalorder %s1456_s27, 1  ;;  %p194_p3 = scmp.ne.s32.totalorder %s1944_s22, %s1940_s21 }
   0x8   : > { %s2440_s29 = smov (%p33_p0, %s31_s29), 0  ;;  %p195_p5 = scmp.eq.s32.totalorder %s1457_s28, 1 }
   0x9   : > { %p2050_p4 = por %p189_p2, %p188_p1  ;;  %s173_s8 = ssub.s32 %s1956_s25, %s2440_s29 }
   0xa   : > { %p1460_p6 = scmp.ge.s32.totalorder %s1960_s26, 1  ;;  %p176_p7 = scmp.eq.s32.totalorder %s173_s8, 0 }
   0xb   : > { %p2057_p8 = por %p195_p5, %p194_p3  ;;  %p242_p9 = scmp.lt.s32.totalorder %s1960_s26, 3 }
   0xc   : > { %s2063_s10 = scalar_select %p176_p7, %s1948_s23, %s178_s30  }
   0xd   : > { %p243_p10 = pnand %p1460_p6, %p242_p9 }
   0xe   : > { %s275_s11 = sand.u32 (!%p243_p10), 1, %s1944_s22   ;;  %p278_p11 = scmp.lt.s32.totalorder (!%p243_p10), %s1952_s24, 1  ;;  %v289_v0 = vld [vmem:[%s2428_s3] sm:$0xff] (!%p243_p10)  ;;  %vm322_vm0 = vcmask (!%p243_p10), 31744   ;;  %vm419_vm1 = vcmask (!%p243_p10), 1043456   ;;  %v290_v3 = vld [vmem:[%s2428_s3 + $0x8] sm:$0xff] (!%p243_p10) }
   0xf   : > { %246 = sbr.rel (%p243_p10) target bundleno = 1308 (0x51c), region = 44  ;;  %v313_v1 = vld [vmem:[%s2428_s3 + $0xc0] sm:$0xff] (!%p243_p10)  ;;  %s2075_s16 = sshll.u32 (!%p243_p10), %s275_s11, 2  ;;  %1619 = vmatprep.mubr.msk.f32.mxu0 (!%p243_p10), %vm322_vm0, %v289_v0  ;;  %v314_v4 = vld [vmem:[%s2428_s3 + $0xc8] sm:$0xff] (!%p243_p10)  ;;  %v291_v6 = vld [vmem:[%s2428_s3 + $0x10] sm:$0xff] (!%p243_p10)  ;;  %vm648_vm2 = vcmask (!%p243_p10), 130048  }
  0x10   : > { %1655 = vmatprep.mubr.msk.f32.mxu1 (!%p243_p10), %vm322_vm0, %v313_v1  ;;  %v315_v7 = vld [vmem:[%s2428_s3 + $0xd0] sm:$0xff] (!%p243_p10)  ;;  %v292_v8 = vld [vmem:[%s2428_s3 + $0x18] sm:$0xff] (!%p243_p10)  ;;  %v293_v10 = vld [vmem:[%s2428_s3 + $0x20] sm:$0xff] (!%p243_p10)  ;;  %s2325_s28 = smov (!%p243_p10), 0  }
  0x11   : > { %v316_v9 = vld [vmem:[%s2428_s3 + $0xd8] sm:$0xff] (!%p243_p10)  ;;  %v317_v11 = vld [vmem:[%s2428_s3 + $0xe0] sm:$0xff] (!%p243_p10)  ;;  %v294_v12 = vld [vmem:[%s2428_s3 + $0x28] sm:$0xff] (!%p243_p10) }
  0x12   : > { %v318_v13 = vld [vmem:[%s2428_s3 + $0xe8] sm:$0xff] (!%p243_p10)  ;;  %v295_v14 = vld [vmem:[%s2428_s3 + $0x30] sm:$0xff] (!%p243_p10)  ;;  %v296_v16 = vld [vmem:[%s2428_s3 + $0x38] sm:$0xff] (!%p243_p10) }
  0x13   : > { %v319_v15 = vld [vmem:[%s2428_s3 + $0xf0] sm:$0xff] (!%p243_p10)  ;;  %v320_v17 = vld [vmem:[%s2428_s3 + $0xf8] sm:$0xff] (!%p243_p10)  ;;  %v297_v18 = vld [vmem:[%s2428_s3 + $0x40] sm:$0xff] (!%p243_p10) }
  0x14   : > { %v681_v19 = vld [vmem:[%s2427_s2] sm:$0xff] (!%p243_p10)  ;;  %v298_v20 = vld [vmem:[%s2428_s3 + $0x48] sm:$0xff] (!%p243_p10)  ;;  %v299_v22 = vld [vmem:[%s2428_s3 + $0x50] sm:$0xff] (!%p243_p10) }
  0x15   : > { %v682_v21 = vld [vmem:[%s2427_s2 + $0x8] sm:$0xff] (!%p243_p10)  ;;  %v683_v23 = vld [vmem:[%s2427_s2 + $0x10] sm:$0xff] (!%p243_p10)  ;;  %v300_v24 = vld [vmem:[%s2428_s3 + $0x58] sm:$0xff] (!%p243_p10) }
  0x16   : > { %s279_s17 = scalar_select %p278_p11, %s1952_s24, 1  ;;  %v684_v25 = vld [vmem:[%s2427_s2 + $0x18] sm:$0xff]  ;;  %v301_v26 = vld [vmem:[%s2428_s3 + $0x60] sm:$0xff]  ;;  %v302_v28 = vld [vmem:[%s2428_s3 + $0x68] sm:$0xff] }
  0x17   : > { %v685_v27 = vld [vmem:[%s2427_s2 + $0x20] sm:$0xff]  ;;  %v686_v29 = vld [vmem:[%s2427_s2 + $0x28] sm:$0xff]  ;;  %v303_v30 = vld [vmem:[%s2428_s3 + $0x70] sm:$0xff] }
  0x18   : > { %s1462_s18 = sshll.u32 %s279_s17, 2  ;;  %v687_v31 = vld [vmem:[%s2427_s2 + $0x30] sm:$0xff]  ;;  %v304_v32 = vld [vmem:[%s2428_s3 + $0x78] sm:$0xff]  ;;  %v305_v34 = vld [vmem:[%s2428_s3 + $0x80] sm:$0xff] }
  0x19   : > { %s281_s27 = scalar_lea.vmem %s2425_s0, %s1462_s18  ;;  %s288_s8 = scalar_lea.vmem %s2426_s1, %s1462_s18  ;;  %v688_v33 = vld [vmem:[%s2427_s2 + $0x38] sm:$0xff]  ;;  %v689_v35 = vld [vmem:[%s2427_s2 + $0x40] sm:$0xff]  ;;  %v306_v36 = vld [vmem:[%s2428_s3 + $0x88] sm:$0xff] }
  0x1a   : > { %v321_v2 = vld [vmem:[%s281_s27] sm:$0xf]  ;;  %v690_v37 = vld [vmem:[%s2427_s2 + $0x48] sm:$0xff]  ;;  %v307_v38 = vld [vmem:[%s2428_s3 + $0x90] sm:$0xff]  ;;  %s277_s27 = scalar_lea.vmem [#allocation5], %s2075_s16 }
  0x1b   : > { %1617 = vmatprep.subr.msk.mxu0 %vm419_vm1, %v321_v2  ;;  %1798 = vmatprep.subr.msk.mxu1 %vm419_vm1, %v321_v2  ;;  %v697_v5 = vld [vmem:[%s288_s8] sm:$0xf]  ;;  %v691_v39 = vld [vmem:[%s2427_s2 + $0x50] sm:$0xff]  ;;  %v308_v40 = vld [vmem:[%s2428_s3 + $0x98] sm:$0xff] }
  0x1c   : > { %1618 = vmatpush3.msk.msra.mxu0 %vm419_vm1, %v321_v2  ;;  %1799 = vmatpush3.msk.msra.mxu1 %vm419_vm1, %v321_v2  ;;  %v692_v41 = vld [vmem:[%s2427_s2 + $0x58] sm:$0xff]  ;;  %v309_v42 = vld [vmem:[%s2428_s3 + $0xa0] sm:$0xff]  ;;  %v310_v44 = vld [vmem:[%s2428_s3 + $0xa8] sm:$0xff] }
  0x1d   : > { %1620 = vmatmul.mubr.msk.f32.vlgmr.msra.gmra.mrb[0].mxu0 %vm322_vm0, %v290_v3  ;;  %1656 = vmatmul.mubr.msk.f32.vlgmr.msra.gmra.mrb[0].mxu1 %vm322_vm0, %v314_v4  ;;  %v693_v43 = vld [vmem:[%s2427_s2 + $0x60] sm:$0xff]  ;;  %v694_v45 = vld [vmem:[%s2427_s2 + $0x68] sm:$0xff]  ;;  %v311_v46 = vld [vmem:[%s2428_s3 + $0xb0] sm:$0xff] }
  0x1e   : > { %1667 = vmatprep.subr.msk.mxu1 %vm419_vm1, %v697_v5  ;;  %1622 = vmatprep.mubr.msk.f32.mxu0 %vm322_vm0, %v291_v6  ;;  %v695_v47 = vld [vmem:[%s2427_s2 + $0x70] sm:$0xff]  ;;  %v312_v48 = vld [vmem:[%s2428_s3 + $0xb8] sm:$0xff] }
  0x1f   : > { %1668 = vmatpush3.msk.msra.mxu1 %vm419_vm1, %v697_v5  ;;  %1658 = vmatprep.mubr.msk.f32.mxu1 %vm322_vm0, %v315_v7  ;;  %v696_v49 = vld [vmem:[%s2427_s2 + $0x78] sm:$0xff] }
  0x21   : > { %1623 = vmatmul.mubr.msk.f32.gmra.mrb[2].mxu0 %vm322_vm0, %v292_v8  ;;  %1659 = vmatmul.mubr.msk.f32.gmra.mrb[2].mxu1 %vm322_vm0, %v316_v9 }
  0x22   : > { %1625 = vmatprep.mubr.msk.f32.mxu0 %vm322_vm0, %v293_v10  ;;  %1661 = vmatprep.mubr.msk.f32.mxu1 %vm322_vm0, %v317_v11 }
  0x25   : > { %1626 = vmatmul.mubr.msk.f32.gmra.mrb[4].mxu0 %vm322_vm0, %v294_v12  ;;  %1662 = vmatmul.mubr.msk.f32.gmra.mrb[4].mxu1 %vm322_vm0, %v318_v13 }
  0x26   : > { %1628 = vmatprep.mubr.msk.f32.mxu0 %vm322_vm0, %v295_v14  ;;  %1664 = vmatprep.mubr.msk.f32.mxu1 %vm322_vm0, %v319_v15 }
  0x29   : > { %1629 = vmatmul.mubr.msk.f32.gmra.mrb[6].mxu0 %vm322_vm0, %v296_v16  ;;  %1665 = vmatmul.mubr.msk.f32.gmra.mrb[6].mxu1 %vm322_vm0, %v320_v17 }
  0x2a   : > { %1631 = vmatprep.mubr.msk.f32.mxu0 %vm322_vm0, %v297_v18  ;;  %1669 = vmatprep.mubr.msk.f32.mxu1 %vm322_vm0, %v681_v19 }
  0x2d   : > { %1632 = vmatmul.mubr.msk.f32.gmra.mrb[8].mxu0 %vm322_vm0, %v298_v20  ;;  %1670 = vmatmul.mubr.msk.f32.vlgmr.msra.gmra.mrb[8].mxu1 %vm322_vm0, %v682_v21 }
  0x2e   : > { %1634 = vmatprep.mubr.msk.f32.mxu0 %vm322_vm0, %v299_v22  ;;  %1672 = vmatprep.mubr.msk.f32.mxu1 %vm322_vm0, %v683_v23 }
  0x31   : > { %1635 = vmatmul.mubr.msk.f32.gmra.mrb[10].mxu0 %vm322_vm0, %v300_v24  ;;  %1673 = vmatmul.mubr.msk.f32.gmra.mrb[10].mxu1 %vm322_vm0, %v684_v25 }
  0x32   : > { %1637 = vmatprep.mubr.msk.f32.mxu0 %vm322_vm0, %v301_v26  ;;  %1675 = vmatprep.mubr.msk.f32.mxu1 %vm322_vm0, %v685_v27 }
  0x35   : > { %1638 = vmatmul.mubr.msk.f32.gmra.mrb[12].mxu0 %vm322_vm0, %v302_v28  ;;  %1676 = vmatmul.mubr.msk.f32.gmra.mrb[12].mxu1 %vm322_vm0, %v686_v29 }
  0x36   : > { %1640 = vmatprep.mubr.msk.f32.mxu0 %vm322_vm0, %v303_v30  ;;  %1678 = vmatprep.mubr.msk.f32.mxu1 %vm322_vm0, %v687_v31 }
  0x39   : > { %1641 = vmatmul.mubr.msk.f32.gmra.mrb[14].mxu0 %vm322_vm0, %v304_v32  ;;  %1679 = vmatmul.mubr.msk.f32.gmra.mrb[14].mxu1 %vm322_vm0, %v688_v33 }
  0x3a   : > { %1643 = vmatprep.mubr.msk.f32.mxu0 %vm322_vm0, %v305_v34  ;;  %1681 = vmatprep.mubr.msk.f32.mxu1 %vm322_vm0, %v689_v35 }
  0x3d   : > { %1644 = vmatmul.mubr.msk.f32.gmra.mrb[16].mxu0 %vm322_vm0, %v306_v36  ;;  %1682 = vmatmul.mubr.msk.f32.gmra.mrb[16].mxu1 %vm322_vm0, %v690_v37 }
  0x3e   : > { %1646 = vmatprep.mubr.msk.f32.mxu0 %vm322_vm0, %v307_v38  ;;  %1684 = vmatprep.mubr.msk.f32.mxu1 %vm322_vm0, %v691_v39 }
  0x41   : > { %1647 = vmatmul.mubr.msk.f32.gmra.mrb[18].mxu0 %vm322_vm0, %v308_v40  ;;  %1685 = vmatmul.mubr.msk.f32.gmra.mrb[18].mxu1 %vm322_vm0, %v692_v41 }
  0x42   : > { %1649 = vmatprep.mubr.msk.f32.mxu0 %vm322_vm0, %v309_v42  ;;  %1687 = vmatprep.mubr.msk.f32.mxu1 %vm322_vm0, %v693_v43 }
  0x45   : > { %1650 = vmatmul.mubr.msk.f32.gmra.mrb[20].mxu0 %vm322_vm0, %v310_v44  ;;  %1688 = vmatmul.mubr.msk.f32.gmra.mrb[20].mxu1 %vm322_vm0, %v694_v45 }
  0x46   : > { %1652 = vmatprep.mubr.msk.f32.mxu0 %vm322_vm0, %v311_v46  ;;  %1690 = vmatprep.mubr.msk.f32.mxu1 %vm322_vm0, %v695_v47 }
  0x49   : > { %1653 = vmatmul.mubr.msk.f32.gmra.mrb[22].mxu0 %vm322_vm0, %v312_v48  ;;  %1691 = vmatmul.mubr.msk.f32.gmra.mrb[22].mxu1 %vm322_vm0, %v696_v49 }
  0xf0   : > { %v1621_v50 = vpop.f32.mrb[0].mxu0  ;;  %v1657_v51 = vpop.f32.mrb[0].mxu1 }
  0xf1   : > { %650 = vst.msk [vmem:[#allocation3 + $0x8] sm:$0xff] %vm648_vm2, %v1621_v50  ;;  %674 = vst.msk [vmem:[#allocation3 + $0xc8] sm:$0xff] %vm648_vm2, %v1657_v51  ;;  %v489_v52 = vpop.f32.mrb[1].mxu0  ;;  %v609_v53 = vpop.f32.mrb[1].mxu1 }
  0xf2   : > { %649 = vst.msk [vmem:[#allocation3] sm:$0xff] %vm648_vm2, %v489_v52  ;;  %673 = vst.msk [vmem:[#allocation3 + $0xc0] sm:$0xff] %vm648_vm2, %v609_v53 }
  0xf4   : > { %v1624_v54 = vpop.f32.mrb[2].mxu0  ;;  %v1660_v55 = vpop.f32.mrb[2].mxu1 }
  0xf5   : > { %652 = vst.msk [vmem:[#allocation3 + $0x18] sm:$0xff] %vm648_vm2, %v1624_v54  ;;  %676 = vst.msk [vmem:[#allocation3 + $0xd8] sm:$0xff] %vm648_vm2, %v1660_v55  ;;  %v499_v56 = vpop.f32.mrb[3].mxu0  ;;  %v619_v57 = vpop.f32.mrb[3].mxu1 }
  0xf6   : > { %651 = vst.msk [vmem:[#allocation3 + $0x10] sm:$0xff] %vm648_vm2, %v499_v56  ;;  %675 = vst.msk [vmem:[#allocation3 + $0xd0] sm:$0xff] %vm648_vm2, %v619_v57 }
  0xf8   : > { %v1627_v58 = vpop.f32.mrb[4].mxu0  ;;  %v1663_v59 = vpop.f32.mrb[4].mxu1 }
  0xf9   : > { %654 = vst.msk [vmem:[#allocation3 + $0x28] sm:$0xff] %vm648_vm2, %v1627_v58  ;;  %678 = vst.msk [vmem:[#allocation3 + $0xe8] sm:$0xff] %vm648_vm2, %v1663_v59  ;;  %v509_v60 = vpop.f32.mrb[5].mxu0  ;;  %v629_v61 = vpop.f32.mrb[5].mxu1 }
  0xfa   : > { %653 = vst.msk [vmem:[#allocation3 + $0x20] sm:$0xff] %vm648_vm2, %v509_v60  ;;  %677 = vst.msk [vmem:[#allocation3 + $0xe0] sm:$0xff] %vm648_vm2, %v629_v61 }
  0xfc   : > { %v1630_v62 = vpop.f32.mrb[6].mxu0  ;;  %v1666_v63 = vpop.f32.mrb[6].mxu1 }
  0xfd   : > { %656 = vst.msk [vmem:[#allocation3 + $0x38] sm:$0xff] %vm648_vm2, %v1630_v62  ;;  %680 = vst.msk [vmem:[#allocation3 + $0xf8] sm:$0xff] %vm648_vm2, %v1666_v63  ;;  %v519_v0 = vpop.f32.mrb[7].mxu0  ;;  %v639_v1 = vpop.f32.mrb[7].mxu1 }
  0xfe   : > { %655 = vst.msk [vmem:[#allocation3 + $0x30] sm:$0xff] %vm648_vm2, %v519_v0  ;;  %679 = vst.msk [vmem:[#allocation3 + $0xf0] sm:$0xff] %vm648_vm2, %v639_v1 }
 0x100   : > { %v1633_v2 = vpop.f32.mrb[8].mxu0  ;;  %v1671_v3 = vpop.f32.mrb[8].mxu1 }
 0x101   : > { %658 = vst.msk [vmem:[#allocation3 + $0x48] sm:$0xff] %vm648_vm2, %v1633_v2  ;;  %895 = vst.msk [vmem:[#allocation2 + $0x8] sm:$0xff] %vm648_vm2, %v1671_v3  ;;  %v529_v4 = vpop.f32.mrb[9].mxu0  ;;  %v815_v5 = vpop.f32.mrb[9].mxu1 }
 0x102   : > { %657 = vst.msk [vmem:[#allocation3 + $0x40] sm:$0xff] %vm648_vm2, %v529_v4  ;;  %894 = vst.msk [vmem:[#allocation2] sm:$0xff] %vm648_vm2, %v815_v5 }
 0x104   : > { %v1636_v6 = vpop.f32.mrb[10].mxu0  ;;  %v1674_v7 = vpop.f32.mrb[10].mxu1 }
 0x105   : > { %660 = vst.msk [vmem:[#allocation3 + $0x58] sm:$0xff] %vm648_vm2, %v1636_v6  ;;  %897 = vst.msk [vmem:[#allocation2 + $0x18] sm:$0xff] %vm648_vm2, %v1674_v7  ;;  %v539_v8 = vpop.f32.mrb[11].mxu0  ;;  %v825_v9 = vpop.f32.mrb[11].mxu1 }
 0x106   : > { %659 = vst.msk [vmem:[#allocation3 + $0x50] sm:$0xff] %vm648_vm2, %v539_v8  ;;  %896 = vst.msk [vmem:[#allocation2 + $0x10] sm:$0xff] %vm648_vm2, %v825_v9 }
 0x108   : > { %v1639_v10 = vpop.f32.mrb[12].mxu0  ;;  %v1677_v11 = vpop.f32.mrb[12].mxu1 }
 0x109   : > { %662 = vst.msk [vmem:[#allocation3 + $0x68] sm:$0xff] %vm648_vm2, %v1639_v10  ;;  %899 = vst.msk [vmem:[#allocation2 + $0x28] sm:$0xff] %vm648_vm2, %v1677_v11  ;;  %v549_v12 = vpop.f32.mrb[13].mxu0  ;;  %v835_v13 = vpop.f32.mrb[13].mxu1 }
 0x10a   : > { %661 = vst.msk [vmem:[#allocation3 + $0x60] sm:$0xff] %vm648_vm2, %v549_v12  ;;  %898 = vst.msk [vmem:[#allocation2 + $0x20] sm:$0xff] %vm648_vm2, %v835_v13 }
 0x10c   : > { %v1642_v14 = vpop.f32.mrb[14].mxu0  ;;  %v1680_v15 = vpop.f32.mrb[14].mxu1 }
 0x10d   : > { %664 = vst.msk [vmem:[#allocation3 + $0x78] sm:$0xff] %vm648_vm2, %v1642_v14  ;;  %901 = vst.msk [vmem:[#allocation2 + $0x38] sm:$0xff] %vm648_vm2, %v1680_v15  ;;  %v559_v16 = vpop.f32.mrb[15].mxu0  ;;  %v845_v17 = vpop.f32.mrb[15].mxu1 }
 0x10e   : > { %663 = vst.msk [vmem:[#allocation3 + $0x70] sm:$0xff] %vm648_vm2, %v559_v16  ;;  %900 = vst.msk [vmem:[#allocation2 + $0x30] sm:$0xff] %vm648_vm2, %v845_v17 }
 0x110   : > { %v1645_v18 = vpop.f32.mrb[16].mxu0  ;;  %v1683_v19 = vpop.f32.mrb[16].mxu1 }
 0x111   : > { %666 = vst.msk [vmem:[#allocation3 + $0x88] sm:$0xff] %vm648_vm2, %v1645_v18  ;;  %903 = vst.msk [vmem:[#allocation2 + $0x48] sm:$0xff] %vm648_vm2, %v1683_v19  ;;  %v569_v20 = vpop.f32.mrb[17].mxu0  ;;  %v855_v21 = vpop.f32.mrb[17].mxu1 }
 0x112   : > { %665 = vst.msk [vmem:[#allocation3 + $0x80] sm:$0xff] %vm648_vm2, %v569_v20  ;;  %902 = vst.msk [vmem:[#allocation2 + $0x40] sm:$0xff] %vm648_vm2, %v855_v21 }
 0x114   : > { %v1648_v22 = vpop.f32.mrb[18].mxu0  ;;  %v1686_v23 = vpop.f32.mrb[18].mxu1 }
 0x115   : > { %668 = vst.msk [vmem:[#allocation3 + $0x98] sm:$0xff] %vm648_vm2, %v1648_v22  ;;  %905 = vst.msk [vmem:[#allocation2 + $0x58] sm:$0xff] %vm648_vm2, %v1686_v23  ;;  %v579_v24 = vpop.f32.mrb[19].mxu0  ;;  %v865_v25 = vpop.f32.mrb[19].mxu1 }
 0x116   : > { %667 = vst.msk [vmem:[#allocation3 + $0x90] sm:$0xff] %vm648_vm2, %v579_v24  ;;  %904 = vst.msk [vmem:[#allocation2 + $0x50] sm:$0xff] %vm648_vm2, %v865_v25 }
 0x118   : > { %v1651_v26 = vpop.f32.mrb[20].mxu0  ;;  %v1689_v27 = vpop.f32.mrb[20].mxu1 }
 0x119   : > { %670 = vst.msk [vmem:[#allocation3 + $0xa8] sm:$0xff] %vm648_vm2, %v1651_v26  ;;  %907 = vst.msk [vmem:[#allocation2 + $0x68] sm:$0xff] %vm648_vm2, %v1689_v27  ;;  %v589_v28 = vpop.f32.mrb[21].mxu0  ;;  %v875_v29 = vpop.f32.mrb[21].mxu1 }
 0x11a   : > { %669 = vst.msk [vmem:[#allocation3 + $0xa0] sm:$0xff] %vm648_vm2, %v589_v28  ;;  %906 = vst.msk [vmem:[#allocation2 + $0x60] sm:$0xff] %vm648_vm2, %v875_v29 }
 0x11c   : > { %v1654_v30 = vpop.f32.mrb[22].mxu0  ;;  %v1692_v31 = vpop.f32.mrb[22].mxu1 }
 0x11d   : > { %672 = vst.msk [vmem:[#allocation3 + $0xb8] sm:$0xff] %vm648_vm2, %v1654_v30  ;;  %909 = vst.msk [vmem:[#allocation2 + $0x78] sm:$0xff] %vm648_vm2, %v1692_v31  ;;  %v599_v32 = vpop.f32.mrb[23].mxu0  ;;  %v885_v33 = vpop.f32.mrb[23].mxu1 }
 0x11e   : > { %671 = vst.msk [vmem:[#allocation3 + $0xb0] sm:$0xff] %vm648_vm2, %v599_v32  ;;  %908 = vst.msk [vmem:[#allocation2 + $0x70] sm:$0xff] %vm648_vm2, %v885_v33 }
 0x11f LB: >> { %s2331_s30 = sshll.u32 %s1964_s28, 5  ;;  %vm965_vm3 = vcmask 261120   ;;  %v1966_v50 = vmov 0.0|0.0   ;;  %vm1967_vm4 = vmmov 0   ;;  %v1968_v51 = vmov 0.0   ;;  %vm1766_vm5 = vmpackc.low %vm648_vm2, %vm648_vm2  ;;  %s915_s28 = sadd.s32 1, %s1964_s28   ;;  %s1964_s28 = sphi %s2325_s28, %s915_s28  }
 0x120   : >> { %s918_s8 = scalar_lea.vmem [#allocation2], %s2331_s30  ;;  %s2335_s12 = scalar_lea.vmem [#allocation3], %s2331_s30  ;;  %v1969_v0 = vmov 1.0   ;;  %v1236_v3 = vlaneseq }
 0x121   : >> { %s1244_s13 = scalar_lea.vmem [#allocation4], %s2331_s30  ;;  %p912_p12 = scmp.ge.s32.totalorder %s915_s28, 4  }
 0x122   : >> { %v1237_v7 = vshrl.u32 %v1236_v3, 7  ;;  %v1970_v20 = vmov (%p912_p12), 0.0|0.0   ;;  %vm1971_vm6 = vmmov (%p912_p12), 0   ;;  %v1972_v23 = vmov (%p912_p12), 0.0   ;;  %v1266_v28 = vld [vmem:[%s2430_s5] sm:$0xf] (%p912_p12) }
 0x123   : > { %v1973_v24 = vmov (%p912_p12), 0   ;;  %s1532_s18 = sshll.u32 (%p912_p12), %s1952_s24, 6  ;;  %s1359_s20 = sshll.u32 (%p912_p12), %s277_s27, 4  ;;  %vm1342_vm7 = vcmask (%p912_p12), 125952   ;;  %s2376_s20 = int_to_ptr.vmem [resolvable:$true] %s1359_s20 }
 0x124   : >> { %v1238_v10 = vsub.s32 0, %v1237_v7  ;;  %s1345_s24 = scalar_lea.sflag (%p912_p12), [#allocation6], %s275_s11 }
 0x125   : >> { %v919_v34 = vld [vmem:[%s918_s8] sm:$0xff]  ;;  %v925_v36 = vld [vmem:[%s2335_s12 + $0x8] sm:$0xff]  ;;  %v926_v39 = vld [vmem:[%s2335_s12 + $0x10] sm:$0xff] }
 0x126   : >> { %933 = vxpose.xlu0.b32.start [1/4] (short) (narrow) %v919_v34, 16  ;;  %v924_v35 = vld [vmem:[%s2335_s12] sm:$0xff]  ;;  %v920_v37 = vld [vmem:[%s918_s8 + $0x8] sm:$0xff]  ;;  %v927_v40 = vld [vmem:[%s2335_s12 + $0x18] sm:$0xff] }
 0x127   : >> { %v1756_v38 = vpack.c.bf16 %v925_v36, %v924_v35  ;;  %v1760_v41 = vpack.c.bf16 %v927_v40, %v926_v39  ;;  %v921_v42 = vld [vmem:[%s918_s8 + $0x10] sm:$0xff]  ;;  %v922_v43 = vld [vmem:[%s918_s8 + $0x18] sm:$0xff]  ;;  %v1516_v52 = vld [vmem:[%s2335_s12 + $0x80] sm:$0xff]  ;;  %s2374_s8 = scalar_lea.hbm (%p912_p12), %s2431_s6, %s1532_s18 }
 0x128   : >> { %1715 = vmatprep.mubr.msk.f32.mxu0 %vm648_vm2, %v1516_v52  ;;  %v1517_v62 = vld [vmem:[%s2335_s12 + $0x88] sm:$0xff]  ;;  %v1518_v63 = vld [vmem:[%s2335_s12 + $0x90] sm:$0xff]  ;;  %v1519_v1 = vld [vmem:[%s2335_s12 + $0x98] sm:$0xff]  ;;  %s1878_s12 = scalar_lea.vmem (%p912_p12), %s2376_s20, 64 }
 0x129   : >> { %1757 = vmatprep.subr.bf16.mxu1 %v1756_v38  ;;  %p1879_p13 = scmp.ne.s32.totalorder (%p912_p12), %s2376_s20, %s1878_s12 }
 0x12a   : >> { %934 = vxpose.xlu0.b32.cont [2/4] (short) (narrow) %v920_v37, 16  ;;  %1759 = vmatpush3.bf16.msra.mxu1 %v1756_v38 }
 0x12b   : >> { %1761 = vmatprep.subr.bf16.mxu1 %v1760_v41  ;;  %p1880_p0 = pnand (%p912_p12), %p1879_p13, %p2050_p4 }
 0x12d   : > { %p1881_p1 = pneg (%p912_p12), %p1880_p0 }
 0x12e   : >> { %935 = vxpose.xlu0.b32.cont [3/4] (short) (narrow) %v921_v42, 16  ;;  %1763 = vmatpush3.bf16.msra.mxu1 %v1760_v41 }
 0x12f   : >> { %1764 = vmatprep.subr.bf16.mxu1 %v1966_v50 }
 0x132   : >> { %936 = vxpose.xlu0.b32.end [4/4] (short) (narrow) %v922_v43, 16 }
 0x15b   : > { %1877 = vset.pattern.permute.xlu0 (%p912_p12), %v1973_v24 }
 0x15c   : > { %1269 = vperm.xlu0 (%p912_p12), %1877, %v1266_v28  }
 0x1a6   : >> { %v949_v44 = vpop.trf.xlu0 }
 0x1a7   : >> { %1701 = vmatprep.mubr.msk.f32.mxu1 %vm965_vm3, %v949_v44 }
 0x1aa   : >> { %v950_v45 = vpop.trf.xlu0 }
 0x1ab   : >> { %1702 = vmatmul.mubr.msk.f32.vlgmr.msra.gmra.mrb[0].mxu1 %vm965_vm3, %v950_v45  ;;  %v1249_v45 = vld [vmem:[%s2429_s4] sm:$0xf] (%p912_p12) }
 0x1ac   : >> { %1708 = vmatprep.mubr.msk.f32.mxu1 %vm1967_vm4, %v1968_v51 }
 0x27e   : >> { %v1703_v46 = vpop.f32.mrb[0].mxu1 }
 0x27f   : >> { %v1038_v47 = vpop.f32.mrb[1].mxu1  ;;  %v1050_v49 = vsel %vm648_vm2, %v1703_v46, -inf }
 0x280   : >> { %v1047_v48 = vsel %vm648_vm2, %v1038_v47, -inf }
 0x281   : >> { %1048 = vmax.xlane.f32.xlu1 %v1047_v48 }
 0x285   : >> { %1051 = vmax.xlane.f32.xlu1 %v1050_v49 }
 0x30e   : >> { %v1049_v53 = vpop.xlane.xlu1 %1048 }
 0x30f   : >> { %v1053_v54 = vsub.f32 %v1038_v47, %v1049_v53 }
 0x311   : >> { %v1055_v55 = vmul.f32 1.442695, %v1053_v54 }
 0x312   : >> { %v1052_v56 = vpop.xlane.xlu1 %1051 }
 0x313   : >> { %v1054_v57 = vsub.f32 %v1703_v46, %v1052_v56  ;;  %1871 = vpow2.f32 %v1055_v55  ;;  %v1270_v46 = vpop.permute.xlu0 (%p912_p12), %1269 }
 0x315   : >> { %v1057_v58 = vmul.f32 1.442695, %v1054_v57 }
 0x317   : >> { %1873 = vpow2.f32 %v1057_v58 }
 0x31d   : >> { %v1872_v59 = vpop.eup %1871 }
 0x321   : >> { %v1874_v60 = vpop.eup %1873 }
 0x322   : >> { %v1765_v61 = vpack.c.bf16 %v1874_v60, %v1872_v59 }
 0x324   : >> { %1767 = vmatpush3.bf16.xpose.msk.msra.mxu1 %vm1766_vm5, %v1765_v61  ;;  %1770 = vmatprep.subr.msk.bf16.mxu0 %vm1766_vm5, %v1765_v61 }
 0x325   : >> { %1773 = vmatpush3.bf16.xpose.msk.msra.mxu0 %vm1766_vm5, %v1765_v61 }
 0x326   : > { %1774 = vmatprep.subr.bf16.mxu0 (%p912_p12), %v1970_v20 }
 0x32b   : >> { %1709 = vmatmul.mubr.msk.f32.vlgmr.msra.gmra.mrb[2].mxu1 %vm648_vm2, %v1969_v0 }
 0x32c   : >> { %1716 = vmatmul.mubr.msk.f32.vlgmr.msra.gmra.mrb[0].mxu0 %vm648_vm2, %v1517_v62 }
 0x32d   : >> { %1718 = vmatprep.mubr.msk.f32.mxu0 %vm648_vm2, %v1518_v63 }
 0x330   : >> { %1719 = vmatmul.mubr.msk.f32.gmra.mrb[2].mxu0 %vm648_vm2, %v1519_v1 }
 0x331   : > { %1753 = vmatprep.mubr.msk.f32.mxu0 (%p912_p12), %vm1971_vm6, %v1972_v23 }
 0x3fe   : >> { %v1134_v2 = vpop.f32.mrb[2].mxu1 }
 0x3ff   : >> { %1875 = vrcp.f32 %v1134_v2  ;;  %v1710_v4 = vpop.f32.mrb[3].mxu1  ;;  %v1717_v5 = vpop.f32.mrb[0].mxu0 }
 0x400   : >> { %v1217_v6 = vpop.f32.mrb[1].mxu0 }
 0x403   : >> { %v1720_v8 = vpop.f32.mrb[2].mxu0 }
 0x404   : >> { %v1227_v9 = vpop.f32.mrb[3].mxu0 }
 0x409   : >> { %v1876_v11 = vpop.eup %1875  ;;  %914 = sbr.rel (!%p912_p12) target bundleno = 287 (0x11f), region = 93 }
 0x40a   : >> { %v1239_v12 = vrot.slane %v1876_v11, %v1238_v10 }
 0x40c   : >> { %v1241_v13 = vmul.f32 %v1717_v5, %v1239_v12  ;;  %v1240_v14 = vmul.f32 %v1239_v12, %v1217_v6  ;;  %v1243_v15 = vmul.f32 %v1720_v8, %v1239_v12  ;;  %v1242_v16 = vmul.f32 %v1239_v12, %v1227_v9 }
 0x40e   : >> { %1246 = vst.msk [vmem:[%s1244_s13 + $0x8] sm:$0xff] %vm648_vm2, %v1241_v13  ;;  %1245 = vst.msk [vmem:[%s1244_s13] sm:$0xff] %vm648_vm2, %v1240_v14 }
 0x40f   : >> { %1248 = vst.msk [vmem:[%s1244_s13 + $0x18] sm:$0xff] %vm648_vm2, %v1243_v15  ;;  %1247 = vst.msk [vmem:[%s1244_s13 + $0x10] sm:$0xff] %vm648_vm2, %v1242_v16  ;;  %s1974_s13 = smov (%p912_p12), [#allocation5]  }
 0x410   : > { %s1882_s14 = sshll.u32 %s1974_s13, 4  ;;  %s1883_s14 = int_to_ptr.vmem [resolvable:$false] %s1882_s14 }
 0x411   : > { %s1884_s15 = scalar_lea.vmem %s1883_s14, 128  ;;  %p1885_p2 = scmp.lt.s32.totalorder %s2376_s20, %s1883_s14 }
 0x412   : > { %p1886_p3 = scmp.lt.s32.totalorder %s1884_s15, %s1878_s12 }
 0x414   : > { %p1887_p5 = por %p1886_p3, %p1885_p2 }
 0x416   : > { %v1250_v17 = vld [vmem:[#allocation4] sm:$0xff]  ;;  %v1251_v18 = vld [vmem:[#allocation4 + $0x8] sm:$0xff]  ;;  %v1252_v19 = vld [vmem:[#allocation4 + $0x10] sm:$0xff]  ;;  %p1888_p6 = pnand %p1887_p5, %p1881_p1 }
 0x417   : > { %v1775_v21 = vpack.c.bf16 %v1251_v18, %v1250_v17  ;;  %v1253_v22 = vld [vmem:[#allocation4 + $0x18] sm:$0xff]  ;;  %v1254_v26 = vld [vmem:[#allocation4 + $0x20] sm:$0xff]  ;;  %v1255_v27 = vld [vmem:[#allocation4 + $0x28] sm:$0xff] }
 0x418   : > { %v1778_v25 = vpack.c.bf16 %v1253_v22, %v1252_v19  ;;  %v1781_v29 = vpack.c.bf16 %v1255_v27, %v1254_v26  ;;  %v1256_v30 = vld [vmem:[#allocation4 + $0x30] sm:$0xff]  ;;  %v1257_v31 = vld [vmem:[#allocation4 + $0x38] sm:$0xff]  ;;  %v1258_v33 = vld [vmem:[#allocation4 + $0x40] sm:$0xff] }
 0x419   : > { %1776 = vmatpush3.bf16.msra.mxu0 %v1775_v21  ;;  %v1784_v32 = vpack.c.bf16 %v1257_v31, %v1256_v30  ;;  %v1259_v34 = vld [vmem:[#allocation4 + $0x48] sm:$0xff]  ;;  %v1260_v36 = vld [vmem:[#allocation4 + $0x50] sm:$0xff]  ;;  %v1261_v37 = vld [vmem:[#allocation4 + $0x58] sm:$0xff] }
 0x41a   : > { %1777 = vmatprep.subr.bf16.mxu0 %v1970_v20  ;;  %v1787_v35 = vpack.c.bf16 %v1259_v34, %v1258_v33  ;;  %v1790_v38 = vpack.c.bf16 %v1261_v37, %v1260_v36  ;;  %v1262_v39 = vld [vmem:[#allocation4 + $0x60] sm:$0xff]  ;;  %v1263_v40 = vld [vmem:[#allocation4 + $0x68] sm:$0xff]  ;;  %v1264_v42 = vld [vmem:[#allocation4 + $0x70] sm:$0xff] }
 0x41b   : > { %v1793_v41 = vpack.c.bf16 %v1263_v40, %v1262_v39  ;;  %v1265_v43 = vld [vmem:[#allocation4 + $0x78] sm:$0xff] }
 0x41c   : > { %v1796_v44 = vpack.c.bf16 %v1265_v43, %v1264_v42 }
 0x41d   : > { %1779 = vmatpush3.bf16.msra.mxu0 %v1778_v25 }
 0x41e   : > { %1780 = vmatprep.subr.bf16.mxu0 %v1970_v20 }
 0x421   : > { %1782 = vmatpush3.bf16.msra.mxu0 %v1781_v29 }
 0x422   : > { %1783 = vmatprep.subr.bf16.mxu0 %v1970_v20 }
 0x425   : > { %1785 = vmatpush3.bf16.msra.mxu0 %v1784_v32 }
 0x426   : > { %1786 = vmatprep.subr.bf16.mxu0 %v1970_v20 }
 0x429   : > { %1788 = vmatpush3.bf16.msra.mxu0 %v1787_v35 }
 0x42a   : > { %1789 = vmatprep.subr.bf16.mxu0 %v1970_v20 }
 0x42d   : > { %1791 = vmatpush3.bf16.msra.mxu0 %v1790_v38 }
 0x42e   : > { %1792 = vmatprep.subr.bf16.mxu0 %v1970_v20 }
 0x431   : > { %1794 = vmatpush3.bf16.msra.mxu0 %v1793_v41 }
 0x432   : > { %1795 = vmatprep.subr.bf16.mxu0 %v1970_v20 }
 0x435   : > { %1797 = vmatpush3.bf16.msra.mxu0 %v1796_v44 }
 0x438   : > { %1754 = vmatmul.mubr.f32.vlgmr.msra.gmra.mrb[0].mxu0 %v1249_v45 }
 0x50b   : > { %v1338_v47 = vpop.f32.mrb[0].mxu0 }
 0x50c   : > { %v1339_v48 = vadd.f32 %v1338_v47, %v1270_v46  ;;  %v1755_v49 = vpop.f32.mrb[1].mxu0 }
 0x50e   : > { %1343 = vst.msk [vmem:[%s277_s27] sm:$0xf] %vm1342_vm7, %v1339_v48 }
 0x50f   : > { %1891 = shalt.err (!%p1888_p6)
}
 0x510   : > { %s1892_s11 = scalar_lea.hbm %s2374_s8, 64  ;;  %s1896_s17 = scalar_lea.hbm %s2431_s6, 128 }
 0x511   : > { %p1893_p7 = scmp.ne.s32.totalorder %s2374_s8, %s1892_s11  ;;  %p1897_p11 = scmp.lt.u32.totalorder %s2374_s8, %s2431_s6 }
 0x512   : > { %p1898_p12 = scmp.lt.u32.totalorder %s1896_s17, %s1892_s11  ;;  %p1900_p0 = scmp.lt.u32.totalorder %s1892_s11, %s2374_s8 }
 0x513   : > { %p1894_p9 = pnand %p1893_p7, %p2050_p4 }
 0x514   : > { %p1899_p13 = por %p1898_p12, %p1897_p11 }
 0x515   : > { %p1895_p10 = pneg %p1894_p9 }
 0x516   : > { %p1901_p1 = por %p1900_p0, %p1899_p13 }
 0x518   : > { %p1902_p2 = pnand %p1901_p1, %p1895_p10 }
 0x51a   : > { %1905 = shalt.err (!%p1902_p2)
}
 0x51b   : > { %1800 = dma.vmem_to_hbm [thread:$0]  (%p2050_p4), %s2376_s20, 64, %s2374_s8, %s1345_s24  }
 0x51c PF: > { %p1806_p3 = scmp.ge.s32.totalorder %s1960_s26, 2  ;;  %s1371_s28 = sand.u32 1, %s1940_s21  }
 0x51d   : > { %s1372_s30 = scalar_lea.sflag [#allocation6], %s1371_s28 }
 0x51e   : > { %p1803_p5 = pnand %p1806_p3, %p2057_p8 }
 0x520   : > { %1935 = dma.done.wait (!%p1803_p5), %s1372_s30, 64  }
 0x521   : > { %1937 = vsyncadd (!%p1803_p5), %s1372_s30, 4294967232  ;;  %s19_s26 = sadd.s32 1, %s1960_s26   ;;  %s2434_s21 = smov %s1944_s22 }
 0x522   : > { %p16_p6 = scmp.ge.s32.totalorder %s19_s26, 4   ;;  %s2435_s22 = smov %s1948_s23 }
 0x523   : > { %s2436_s23 = smov %s2063_s10  ;;  %s2437_s24 = smov %s1956_s25 }
 0x524   : > { %s2438_s25 = smov %s2440_s29  ;;  %18 = sbr.rel (!%p16_p6) target bundleno = 4 (0x4), region = 104 }
 0x52b   :  { %1377 = vsyncpa [#allocation6], 1 }
 0x52c   :  { %1379 = vsyncpa [#allocation6 + $0x1], 1 }

</bundles_post_ra>
